<compile_context>
chip_gen: v7x
topology: tpu7x:2x2x1
jax: 0.10.0
libtpu: 0.0.40
codegen_flags: <defaults>
</compile_context>

<pallas_src>
import jax
import jax.numpy as jnp
from jax.experimental import pallas as pl
from jax.experimental.pallas import tpu as pltpu

_LANE = 128
_SUB = 8


def _round_up(n, m):
    return ((n + m - 1) // m) * m


def _make_pooled_kernel(batch_size, n_pass, pooled_cols, pass_cols, acc_rows):
    """Kernel for the case with >=1 pooled (node-level) input.

    Grid: 1-D over node chunks (reduction axis, "arbitrary").
    refs: ext_ids (1, CHUNK) int32, x_stack (CHUNK, Fp), *pass_through,
          out (B, total_cols), acc (acc_rows, Fp) f32, cnt (acc_rows, 1) f32.
    """

    def kernel(ext_ids_ref, xstack_ref, *rest):
        pass_refs = rest[:n_pass]
        out_ref = rest[n_pass]
        acc_ref = rest[n_pass + 1]
        cnt_ref = rest[n_pass + 2]

        c = pl.program_id(0)
        n_chunks = pl.num_programs(0)

        @pl.when(c == 0)
        def _init():
            acc_ref[...] = jnp.zeros_like(acc_ref)
            cnt_ref[...] = jnp.zeros_like(cnt_ref)

        chunk = xstack_ref.shape[0]
        # One-hot of the extended segment ids for this node chunk only.
        seg = jax.lax.broadcasted_iota(jnp.int32, (acc_rows, chunk), 0)
        onehot = (ext_ids_ref[...] == seg).astype(jnp.float32)  # (acc_rows, chunk)

        # Per-segment node counts via a cross-lane reduce (XLU slot is idle
        # here) — no lane-padded indicator matrix, no extra MXU launch.
        cnt_ref[...] += jnp.sum(onehot, axis=1, keepdims=True)

        xv = xstack_ref[...]
        if xv.dtype == jnp.bfloat16:
            # 0/1 one-hot is exact in bf16 -> fast bf16 MXU path, f32 accum.
            acc_ref[...] += jnp.dot(onehot.astype(jnp.bfloat16), xv,
                                    preferred_element_type=jnp.float32)
        else:
            # Explicit f32-grade matmul (v5e has no native f32 MXU datapath;
            # default precision could silently be bf16-accurate).
            acc_ref[...] += jnp.dot(onehot, xv.astype(jnp.float32),
                                    preferred_element_type=jnp.float32,
                                    precision=jax.lax.Precision.HIGHEST)

        @pl.when(c == n_chunks - 1)
        def _finalize():
            # Counts are small exact integers; exact divide (empty segments:
            # sums are already 0, so clamping the count to 1 gives mean 0).
            inv = 1.0 / jnp.maximum(cnt_ref[...], 1.0)          # (acc_rows, 1)
            pooled = acc_ref[...] * inv                          # (acc_rows, Fp)
            for j, (coff, fj) in enumerate(pooled_cols):
                out_ref[:, coff:coff + fj] = (
                    pooled[j * batch_size:(j + 1) * batch_size, :fj]
                ).astype(out_ref.dtype)
            for pref, (coff, fj) in zip(pass_refs, pass_cols):
                out_ref[:, coff:coff + fj] = pref[...].astype(out_ref.dtype)

    return kernel


def _make_pass_only_kernel(cols):
    """All inputs already have batch_size rows: pure concatenation."""

    def kernel(*refs):
        out_ref = refs[-1]
        for x_ref, (coff, fj) in zip(refs[:-1], cols):
            out_ref[:, coff:coff + fj] = x_ref[...].astype(out_ref.dtype)

    return kernel


def tox21_concat(values, batch_size):
    """values: list of (x, batch_or_None). Mirrors Tox21Concat.forward.

    x: [num_rows, feat]; batch: [num_rows] int32 graph assignment, required
    whenever num_rows != batch_size (node-level features).
    Returns the concatenated [batch_size, sum(feat)] array.
    """
    # PyTorch: a single value is returned untouched (no pooling).
    if len(values) == 1:
        return values[0][0]

    out_dtype = jnp.result_type(*[x.dtype for x, _ in values])

    pooled, passthrough = [], []
    pooled_cols, pass_cols = [], []
    col_off = 0
    for x, batch in values:
        n_rows, feat = x.shape
        if n_rows != batch_size:
            assert batch is not None, "node-level input needs a batch vector"
            pooled.append((x, batch))
            pooled_cols.append((col_off, feat))
        else:
            passthrough.append(x)
            pass_cols.append((col_off, feat))
        col_off += feat
    total_cols = col_off
    out_shape = jax.ShapeDtypeStruct((batch_size, total_cols), out_dtype)

    if not pooled:
        kernel = _make_pass_only_kernel(tuple(pass_cols))
        return pl.pallas_call(
            kernel,
            out_shape=out_shape,
            in_specs=[pl.BlockSpec(memory_space=pltpu.MemorySpace.VMEM)]
            * len(passthrough),
            out_specs=pl.BlockSpec(memory_space=pltpu.MemorySpace.VMEM),
        )(*passthrough)

    # ----- build the node-stacked pooled input + extended segment ids -------
    n_pool = len(pooled)
    fp = _round_up(max(x.shape[1] for x, _ in pooled), _LANE)
    x_dtype = jnp.result_type(*[x.dtype for x, _ in pooled])
    n_total = sum(x.shape[0] for x, _ in pooled)

    chunk = min(512, _round_up(n_total, _LANE))       # node-chunk (lane aligned)
    n_pad = _round_up(n_total, chunk)
    num_chunks = n_pad // chunk

    acc_rows = _round_up(n_pool * batch_size, _SUB)
    sentinel = acc_rows        # never matches any iota row id in [0, acc_rows)

    x_parts, id_parts = [], []
    for j, (x, batch) in enumerate(pooled):
        xp = x.astype(x_dtype)
        if xp.shape[1] != fp:
            xp = jnp.pad(xp, ((0, 0), (0, fp - xp.shape[1])))
        x_parts.append(xp)
        id_parts.append(batch.astype(jnp.int32) + j * batch_size)
    x_stack = x_parts[0] if n_pool == 1 else jnp.concatenate(x_parts, axis=0)
    ext_ids = id_parts[0] if n_pool == 1 else jnp.concatenate(id_parts, axis=0)
    if n_pad != n_total:
        x_stack = jnp.pad(x_stack, ((0, n_pad - n_total), (0, 0)))
        ext_ids = jnp.pad(ext_ids, (0, n_pad - n_total), constant_values=sentinel)
    ext_ids = ext_ids.reshape(1, n_pad)

    kernel = _make_pooled_kernel(batch_size, len(passthrough),
                                 tuple(pooled_cols), tuple(pass_cols), acc_rows)

    in_specs = [
        pl.BlockSpec((1, chunk), lambda c: (0, c)),       # ext segment ids
        pl.BlockSpec((chunk, fp), lambda c: (c, 0)),      # stacked node feats
    ] + [
        pl.BlockSpec(x.shape, lambda c: (0, 0)) for x in passthrough
    ]
    out_spec = pl.BlockSpec((batch_size, total_cols), lambda c: (0, 0))

    # Scoped-VMEM budget sized to actual residency (matters for v5e's 16 MiB
    # default when chunks / feature widths get large).
    x_bytes = jnp.dtype(x_dtype).itemsize
    est = (2 * chunk * fp * x_bytes                       # double-buffered x chunks
           + 2 * _SUB * chunk * 4                         # ext-id chunks
           + acc_rows * fp * 4                            # accumulator
           + acc_rows * _LANE * 4                         # counts (lane-padded)
           + _round_up(batch_size, _SUB) * _round_up(total_cols, _LANE)
           * jnp.dtype(out_dtype).itemsize                # resident output
           + sum(_round_up(x.shape[0], _SUB) * _round_up(x.shape[1], _LANE)
                 * jnp.dtype(x.dtype).itemsize for x in passthrough))
    vmem_limit = int(min(32 * 1024 * 1024, max(4 * 1024 * 1024, 2 * est)))

    return pl.pallas_call(
        kernel,
        out_shape=out_shape,
        grid=(num_chunks,),
        in_specs=in_specs,
        out_specs=out_spec,
        scratch_shapes=[pltpu.VMEM((acc_rows, fp), jnp.float32),
                        pltpu.VMEM((acc_rows, 1), jnp.float32)],
        compiler_params=pltpu.CompilerParams(
            dimension_semantics=("arbitrary",),
            vmem_limit_bytes=vmem_limit),
    )(ext_ids, x_stack, *passthrough)


def _reference(values, batch_size):
    cols = []
    for x, batch in values:
        if x.shape[0] != batch_size:
            sums = jax.ops.segment_sum(x.astype(jnp.float32), batch,
                                       num_segments=batch_size)
            cnt = jax.ops.segment_sum(jnp.ones((x.shape[0],), jnp.float32),
                                      batch, num_segments=batch_size)
            cols.append(sums / jnp.maximum(cnt, 1.0)[:, None])
        else:
            cols.append(x.astype(jnp.float32))
    return jnp.concatenate(cols, axis=1)


if __name__ == "__main__":
    key = jax.random.PRNGKey(0)
    B = 8                       # batch_size (number of graphs)
    N1, F1 = 64, 128            # node-level input 1
    N2, F2 = 48, 128            # node-level input 2
    F3 = 128                    # already graph-level input

    k1, k2, k3 = jax.random.split(key, 3)
    x1 = jax.random.normal(k1, (N1, F1), jnp.float32)
    x2 = jax.random.normal(k2, (N2, F2), jnp.float32)
    x3 = jax.random.normal(k3, (B, F3), jnp.float32)   # size(0)==batch_size -> no pool

    # sorted graph-assignment vectors (torch_geometric convention)
    batch1 = (jnp.arange(N1) * B // N1).astype(jnp.int32)
    batch2 = (jnp.arange(N2) * B // N2).astype(jnp.int32)

    values = [(x1, batch1), (x2, batch2), (x3, None)]

    out = jax.block_until_ready(tox21_concat(values, B))
    ref = _reference(values, B)

    assert out.shape == (B, F1 + F2 + F3)
    # Exact divide + f32-precision segment sums -> tight tolerance again.
    assert jnp.allclose(out.astype(jnp.float32), ref, atol=1e-4, rtol=1e-4), \
        float(jnp.max(jnp.abs(out.astype(jnp.float32) - ref)))
    print("KERNEL_OK")
</pallas_src>

<mosaic_0001>
module attributes {stable_mosaic.version = 11 : i64} {
  func.func @kernel(%arg0: i32, %arg1: memref<1x128xi32, #tpu.memory_space<vmem>>, %arg2: memref<128x128xf32, #tpu.memory_space<vmem>>, %arg3: memref<8x128xf32, #tpu.memory_space<vmem>>, %arg4: memref<8x384xf32, #tpu.memory_space<vmem>>, %arg5: memref<16x128xf32, #tpu.memory_space<vmem>>, %arg6: memref<16x1xf32, #tpu.memory_space<vmem>>) attributes {dimension_semantics = [#tpu.dimension_semantics<arbitrary>], iteration_bounds = array<i64: 1>, scalar_prefetch = 0 : i64, scratch_operands = 2 : i64, tpu.core_type = #tpu.core_type<tc>, window_params = [{transform_indices = @transform_0, window_bounds = array<i64: 1, 128>}, {transform_indices = @transform_1, window_bounds = array<i64: 128, 128>}, {pipeline_mode = #tpu.pipeline_mode<synchronous>, transform_indices = @transform_2, window_bounds = array<i64: 8, 128>}, {pipeline_mode = #tpu.pipeline_mode<synchronous>, transform_indices = @transform_3, window_bounds = array<i64: 8, 384>}]} {
    %c0_i32 = arith.constant 0 : i32
    %0 = arith.cmpi eq, %arg0, %c0_i32 : i32
    %1 = arith.extui %0 : i1 to i32
    %c0_i32_0 = arith.constant 0 : i32
    %2 = arith.cmpi ne, %1, %c0_i32_0 : i32
    scf.if %2 {
      %cst_15 = arith.constant 0.000000e+00 : f32
      %22 = vector.broadcast %cst_15 : f32 to vector<16x128xf32>
      %c0_16 = arith.constant 0 : index
      %c0_17 = arith.constant 0 : index
      %23 = vector.load %arg5[%c0_16, %c0_17] : memref<16x128xf32, #tpu.memory_space<vmem>>, vector<16x128xf32>
      tpu.vector_store %arg5[%c0_16, %c0_17], %22 {strides = array<i32>} : memref<16x128xf32, #tpu.memory_space<vmem>>, vector<16x128xf32>,
      %cst_18 = arith.constant 0.000000e+00 : f32
      %24 = vector.broadcast %cst_18 : f32 to vector<16x1xf32>
      %c0_19 = arith.constant 0 : index
      %c0_20 = arith.constant 0 : index
      %25 = vector.load %arg6[%c0_19, %c0_20] : memref<16x1xf32, #tpu.memory_space<vmem>>, vector<16x1xf32>
      tpu.vector_store %arg6[%c0_19, %c0_20], %24 {strides = array<i32>} : memref<16x1xf32, #tpu.memory_space<vmem>>, vector<16x1xf32>,
    } else {
    }
    %3 = tpu.iota {dimensions = array<i32: 0>} : vector<16x128xi32>
    %c0 = arith.constant 0 : index
    %c0_1 = arith.constant 0 : index
    %4 = vector.load %arg1[%c0, %c0_1] : memref<1x128xi32, #tpu.memory_space<vmem>>, vector<1x128xi32>
    %5 = vector.broadcast %4 : vector<1x128xi32> to vector<16x128xi32>
    %6 = arith.cmpi eq, %5, %3 : vector<16x128xi32>
    %7 = arith.extui %6 : vector<16x128xi1> to vector<16x128xi32>
    %8 = arith.sitofp %7 : vector<16x128xi32> to vector<16x128xf32>
    %c0_2 = arith.constant 0 : index
    %c0_3 = arith.constant 0 : index
    %9 = vector.load %arg6[%c0_2, %c0_3] : memref<16x1xf32, #tpu.memory_space<vmem>>, vector<16x1xf32>
    %cst = arith.constant dense<0.000000e+00> : vector<16xf32>
    %10 = vector.multi_reduction <add>, %8, %cst [1] : vector<16x128xf32> to vector<16xf32>
    %11 = vector.shape_cast %10 : vector<16xf32> to vector<16x1xf32>
    %12 = arith.addf %9, %11 : vector<16x1xf32>
    %c0_4 = arith.constant 0 : index
    %c0_5 = arith.constant 0 : index
    %13 = vector.load %arg6[%c0_4, %c0_5] : memref<16x1xf32, #tpu.memory_space<vmem>>, vector<16x1xf32>
    tpu.vector_store %arg6[%c0_4, %c0_5], %12 {strides = array<i32>} : memref<16x1xf32, #tpu.memory_space<vmem>>, vector<16x1xf32>,
    %c0_6 = arith.constant 0 : index
    %c0_7 = arith.constant 0 : index
    %14 = vector.load %arg2[%c0_6, %c0_7] : memref<128x128xf32, #tpu.memory_space<vmem>>, vector<128x128xf32>
    %c0_8 = arith.constant 0 : index
    %c0_9 = arith.constant 0 : index
    %15 = vector.load %arg5[%c0_8, %c0_9] : memref<16x128xf32, #tpu.memory_space<vmem>>, vector<16x128xf32>
    %cst_10 = arith.constant dense<0.000000e+00> : vector<16x128xf32>
    %16 = tpu.matmul %8, %14, %cst_10 {dimension_numbers = #tpu.dot_dimension_numbers<[1], [0], [0], [1], [0, 0, 1, 1], [], []>, precision = #tpu.contract_precision<fp32>} : vector<16x128xf32>, vector<128x128xf32>, vector<16x128xf32> -> vector<16x128xf32>
    %17 = arith.addf %15, %16 : vector<16x128xf32>
    %c0_11 = arith.constant 0 : index
    %c0_12 = arith.constant 0 : index
    %18 = vector.load %arg5[%c0_11, %c0_12] : memref<16x128xf32, #tpu.memory_space<vmem>>, vector<16x128xf32>
    tpu.vector_store %arg5[%c0_11, %c0_12], %17 {strides = array<i32>} : memref<16x128xf32, #tpu.memory_space<vmem>>, vector<16x128xf32>,
    %c0_i32_13 = arith.constant 0 : i32
    %19 = arith.cmpi eq, %arg0, %c0_i32_13 : i32
    %20 = arith.extui %19 : i1 to i32
    %c0_i32_14 = arith.constant 0 : i32
    %21 = arith.cmpi ne, %20, %c0_i32_14 : i32
    scf.if %21 {
      %c0_15 = arith.constant 0 : index
      %c0_16 = arith.constant 0 : index
      %22 = vector.load %arg6[%c0_15, %c0_16] : memref<16x1xf32, #tpu.memory_space<vmem>>, vector<16x1xf32>
      %cst_17 = arith.constant 1.000000e+00 : f32
      %23 = vector.broadcast %cst_17 : f32 to vector<16x1xf32>
      %24 = arith.maximumf %22, %23 : vector<16x1xf32>
      %cst_18 = arith.constant 1.000000e+00 : f32
      %25 = vector.broadcast %cst_18 : f32 to vector<16x1xf32>
      %26 = arith.divf %25, %24 : vector<16x1xf32>
      %c0_19 = arith.constant 0 : index
      %c0_20 = arith.constant 0 : index
      %27 = vector.load %arg5[%c0_19, %c0_20] : memref<16x128xf32, #tpu.memory_space<vmem>>, vector<16x128xf32>
      %28 = vector.broadcast %26 : vector<16x1xf32> to vector<16x128xf32>
      %29 = arith.mulf %27, %28 : vector<16x128xf32>
      %30 = vector.extract_strided_slice %29 {offsets = [0, 0], sizes = [8, 128], strides = [1, 1]} : vector<16x128xf32> to vector<8x128xf32>
      %c0_21 = arith.constant 0 : index
      %c0_22 = arith.constant 0 : index
      %31 = vector.load %arg4[%c0_21, %c0_22] : memref<8x384xf32, #tpu.memory_space<vmem>>, vector<8x128xf32>
      tpu.vector_store %arg4[%c0_21, %c0_22], %30 {strides = array<i32>} : memref<8x384xf32, #tpu.memory_space<vmem>>, vector<8x128xf32>,
      %32 = vector.extract_strided_slice %29 {offsets = [8, 0], sizes = [8, 128], strides = [1, 1]} : vector<16x128xf32> to vector<8x128xf32>
      %c0_23 = arith.constant 0 : index
      %c128 = arith.constant 128 : index
      %33 = vector.load %arg4[%c0_23, %c128] : memref<8x384xf32, #tpu.memory_space<vmem>>, vector<8x128xf32>
      tpu.vector_store %arg4[%c0_23, %c128], %32 {strides = array<i32>} : memref<8x384xf32, #tpu.memory_space<vmem>>, vector<8x128xf32>,
      %c0_24 = arith.constant 0 : index
      %c0_25 = arith.constant 0 : index
      %34 = vector.load %arg3[%c0_24, %c0_25] : memref<8x128xf32, #tpu.memory_space<vmem>>, vector<8x128xf32>
      %c0_26 = arith.constant 0 : index
      %c256 = arith.constant 256 : index
      %35 = vector.load %arg4[%c0_26, %c256] : memref<8x384xf32, #tpu.memory_space<vmem>>, vector<8x128xf32>
      tpu.vector_store %arg4[%c0_26, %c256], %34 {strides = array<i32>} : memref<8x384xf32, #tpu.memory_space<vmem>>, vector<8x128xf32>,
    } else {
    }
    return
  }
  func.func @transform_0(%arg0: i32) -> (i32, i32) {
    %c0_i32 = arith.constant 0 : i32
    %c0_i32_0 = arith.constant 0 : i32
    return %c0_i32, %arg0 : i32, i32
  }
  func.func @transform_1(%arg0: i32) -> (i32, i32) {
    %c0_i32 = arith.constant 0 : i32
    %c0_i32_0 = arith.constant 0 : i32
    return %arg0, %c0_i32 : i32, i32
  }
  func.func @transform_2(%arg0: i32) -> (i32, i32) {
    %c0_i32 = arith.constant 0 : i32
    %c0_i32_0 = arith.constant 0 : i32
    %c0_i32_1 = arith.constant 0 : i32
    return %c0_i32, %c0_i32_0 : i32, i32
  }
  func.func @transform_3(%arg0: i32) -> (i32, i32) {
    %c0_i32 = arith.constant 0 : i32
    %c0_i32_0 = arith.constant 0 : i32
    %c0_i32_1 = arith.constant 0 : i32
    return %c0_i32, %c0_i32_0 : i32, i32
  }
}

</mosaic_0001>

<bundles_post_ra>
// kernel: tpu_custom_call.1
= control target key start
LH: loop header
LB: loop body
LE: loop exit
PB: predicated region body
PF: predicated region fallthrough
CT: control target
= control target key end

     0   :  { %8 = vsyncpa [#allocation5], 0  ;;  %s1851_s0 = inlined_call_operand.hbm [shape: s32[1,128], index: 0, kind: input, shape index: {}]   ;;  %s1852_s1 = inlined_call_operand.hbm [shape: f32[128,128], index: 1, kind: input, shape index: {}]   ;;  %s1853_s2 = inlined_call_operand.hbm [shape: f32[8,128], index: 2, kind: input, shape index: {}]   ;;  %s1854_s3 = inlined_call_operand.hbm [shape: f32[8,384], index: 3, kind: output, shape index: {}]  }
   0x1   :  { %9 = vsyncpa [#allocation8], 0 }
   0x2   :  { %10 = vsyncpa [#allocation6], 0  ;;  %s1475_s12 = smov [#allocation7]   ;;  %s1381_s16 = scalar_lea.hbm %s1852_s1, 2048 }
   0x3   :  { %s26_s13 = sshll.u32 %s1475_s12, 4  ;;  %p1382_p0 = scmp.ne.s32.totalorder %s1852_s1, %s1381_s16  ;;  %s27_s13 = int_to_ptr.vmem [resolvable:$true] %s26_s13 }
   0x4   :  { %p1385_p1 = scmp.lt.u32.totalorder %s1381_s16, %s1852_s1 }
   0x6   :  { %p1387_p2 = pnand %p1385_p1, %p1382_p0 }
   0x8   :  { %1390 = shalt.err (!%p1387_p2)
}
   0x9   :  { %s1391_s21 = scalar_lea.vmem %s27_s13, 2048  ;;  %p1396_p4 = scmp.lt.s32.totalorder %s27_s13, %s27_s13 }
   0xa   :  { %p1392_p3 = scmp.ne.s32.totalorder %s27_s13, %s1391_s21  ;;  %p1397_p5 = scmp.lt.s32.totalorder %s1391_s21, %s1391_s21 }
   0xc   :  { %p1398_p6 = por %p1397_p5, %p1396_p4 }
   0xe   :  { %p1399_p7 = pnand %p1398_p6, %p1392_p3 }
  0x10   :  { %1402 = shalt.err (!%p1399_p7)
}
  0x11   :  { %s1476_s22 = smov 128   ;;  %s1477_s23 = smov 8  }
  0x12   :  { %32 = dma.hbm_to_vmem [thread:$0]  %s1852_s1, 2048, %s27_s13, [#allocation8], %s1476_s22, %s1476_s22, %s1477_s23  }
  0x13   :  { %s1478_s26 = smov [#allocation4]   ;;  %s1479_s28 = smov [#allocation9]  }
  0x14   :  { %s17_s27 = sshll.u32 %s1478_s26, 4  ;;  %s39_s29 = sshll.u32 %s1479_s28, 4  ;;  %s18_s27 = int_to_ptr.vmem [resolvable:$true] %s17_s27  ;;  %s40_s29 = int_to_ptr.vmem [resolvable:$true] %s39_s29 }
  0x15   :  { %s1403_s5 = scalar_lea.hbm %s1851_s0, 16 }
  0x16   :  { %p1404_p8 = scmp.ne.s32.totalorder %s1851_s0, %s1403_s5  ;;  %p1407_p9 = scmp.lt.u32.totalorder %s1403_s5, %s1851_s0 }
  0x18   :  { %p1409_p10 = pnand %p1407_p9, %p1404_p8 }
  0x1a   :  { %1412 = shalt.err (!%p1409_p10)
}
  0x1b   :  { %s1413_s1 = scalar_lea.vmem %s18_s27, 16  ;;  %s1417_s10 = scalar_lea.vmem %s18_s27, 32 }
  0x1c   :  { %p1414_p11 = scmp.ne.s32.totalorder %s18_s27, %s1413_s1  ;;  %p1418_p12 = scmp.lt.s32.totalorder %s18_s27, %s18_s27 }
  0x1d   :  { %p1419_p13 = scmp.lt.s32.totalorder %s1417_s10, %s1413_s1 }
  0x1f   :  { %p1420_p0 = por %p1419_p13, %p1418_p12 }
  0x21   :  { %p1421_p1 = pnand %p1420_p0, %p1414_p11 }
  0x23   :  { %1424 = shalt.err (!%p1421_p1)
}
  0x24   :  { %20 = dma.hbm_to_vmem [thread:$0]  %s1851_s0, 16, %s18_s27, [#allocation5]  }
  0x25   :  { %s1425_s15 = scalar_lea.hbm %s1853_s2, 128 }
  0x26   :  { %p1426_p2 = scmp.ne.s32.totalorder %s1853_s2, %s1425_s15  ;;  %p1429_p3 = scmp.lt.u32.totalorder %s1425_s15, %s1853_s2 }
  0x28   :  { %p1431_p4 = pnand %p1429_p3, %p1426_p2 }
  0x2a   :  { %1434 = shalt.err (!%p1431_p4)
}
  0x2b   :  { %s1435_s20 = scalar_lea.vmem %s40_s29, 128  ;;  %p1440_p6 = scmp.lt.s32.totalorder %s40_s29, %s40_s29 }
  0x2c   :  { %p1436_p5 = scmp.ne.s32.totalorder %s40_s29, %s1435_s20  ;;  %p1441_p7 = scmp.lt.s32.totalorder %s1435_s20, %s1435_s20 }
  0x2e   :  { %p1442_p8 = por %p1441_p7, %p1440_p6 }
  0x30   :  { %p1443_p9 = pnand %p1442_p8, %p1436_p5 }
  0x32   :  { %1446 = shalt.err (!%p1443_p9)
}
  0x33   :  { %42 = dma.hbm_to_vmem [thread:$0]  %s1853_s2, 128, %s40_s29, [#allocation8]  }
  0x34   :  { %1469 = dma.done.wait [#allocation5], 16  }
  0x35   :  { %1470 = vsyncadd [#allocation5], 4294967280 }
  0x36   :  { %1471 = dma.done.wait [#allocation8], 2176  }
  0x37   :  { %1472 = vsyncadd [#allocation8], 4294965120  ;;  %vm58_vm0 = vcmask 7168   ;;  %v1480_v0 = vmov 0.0   ;;  %v61_v1 = vlaneseq  ;;  %v86_v3 = vld [vmem:[#allocation7] sm:$0xff]  ;;  %v87_v4 = vld [vmem:[#allocation7 + $0x8] sm:$0xff] }
  0x38   :  { %59 = vst.msk [vmem:[#allocation3] sm:$0xff] %vm58_vm0, %v1480_v0  ;;  %60 = vst.msk [vmem:[#allocation3 + $0x8] sm:$0xff] %vm58_vm0, %v1480_v0  ;;  %v1544_v5 = vld [vmem:[#allocation7 + $0x10] sm:$0xff]  ;;  %v105_v6 = vand.u32 4294901760, %v86_v3  ;;  %v108_v7 = vand.u32 4294901760, %v87_v4  ;;  %v1546_v8 = vld [vmem:[#allocation7 + $0x18] sm:$0xff] }
  0x39   :  { %v1542_v2 = vshrl.u32 %v61_v1, 7  ;;  %v111_v9 = vand.u32 4294901760, %v1544_v5  ;;  %v1549_v10 = vld [vmem:[#allocation7 + $0x20] sm:$0xff]  ;;  %v1551_v11 = vld [vmem:[#allocation7 + $0x28] sm:$0xff]  ;;  %v114_v12 = vand.u32 4294901760, %v1546_v8  ;;  %v1572_v20 = vld [vmem:[#allocation7 + $0x30] sm:$0xff] }
  0x3a   :  { %v1554_v13 = vld [vmem:[#allocation4] ss:$0 sm:$0xff]  ;;  %v1559_v15 = vpack.c.bf16 %v108_v7, %v105_v6  ;;  %v117_v16 = vand.u32 4294901760, %v1549_v10  ;;  %v120_v17 = vand.u32 4294901760, %v1551_v11  ;;  %v123_v24 = vand.u32 4294901760, %v1572_v20  ;;  %v1594_v26 = vld [vmem:[#allocation7 + $0x40] sm:$0xff] }
  0x3b   :  { %v1557_v14 = vadd.s32 8, %v1542_v2  ;;  %vm69_vm1 = vcmp.eq.s32.totalorder %v1554_v13, %v1542_v2  ;;  %v1567_v18 = vpack.c.bf16 %v114_v12, %v111_v9  ;;  %v1574_v21 = vld [vmem:[#allocation7 + $0x38] sm:$0xff]  ;;  %v1596_v27 = vld [vmem:[#allocation7 + $0x48] sm:$0xff]  ;;  %v129_v32 = vand.u32 4294901760, %v1594_v26  ;;  %v1611_v34 = vld [vmem:[#allocation7 + $0x50] sm:$0xff]  ;;  %s1483_s2 = smov [#allocation10]  }
  0x3c   :  { %v838_v19 = vsel %vm69_vm1, 1.0, %v1480_v0  ;;  %1165 = vmatprep.subr.bf16.mxu1 %v1559_v15  ;;  %1261 = vmatprep.subr.bf16.mxu0 %v1559_v15  ;;  %v1590_v23 = vpack.c.bf16 %v120_v17, %v117_v16  ;;  %v126_v25 = vand.u32 4294901760, %v1574_v21  ;;  %v132_v33 = vand.u32 4294901760, %v1596_v27  ;;  %v1613_v35 = vld [vmem:[#allocation7 + $0x58] sm:$0xff]  ;;  %v1627_v40 = vld [vmem:[#allocation7 + $0x60] sm:$0xff]  ;;  %v1629_v41 = vld [vmem:[#allocation7 + $0x68] sm:$0xff] }
  0x3d   :  { %v1578_v22 = vsub.f32 %v838_v19, %v838_v19  ;;  %1167 = vmatpush3.bf16.msra.mxu1 %v1559_v15  ;;  %1263 = vmatpush3.bf16.msra.mxu0 %v1559_v15  ;;  %vm70_vm2 = vcmp.eq.s32.totalorder %v1554_v13, %v1557_v14  ;;  %v135_v37 = vand.u32 4294901760, %v1611_v34  ;;  %v138_v39 = vand.u32 4294901760, %v1613_v35  ;;  %v1639_v46 = vld [vmem:[#allocation7 + $0x70] sm:$0xff]  ;;  %v1652_v49 = vld [vmem:[#allocation7 + $0x78] sm:$0xff]  ;;  %v819_v14 = vld [vmem:[#allocation9] sm:$0xff]  ;;  %s827_s22 = sshll.u32 %s1483_s2, 4  ;;  %s828_s22 = int_to_ptr.vmem [resolvable:$true] %s827_s22 }
  0x3e   :  { %1169 = vmatprep.subr.bf16.mxu1 %v1567_v18  ;;  %1265 = vmatprep.subr.bf16.mxu0 %v1567_v18  ;;  %v839_v29 = vsel %vm70_vm2, 1.0, %v1480_v0  ;;  %v1607_v31 = vpack.c.bf16 %v126_v25, %v123_v24  ;;  %v1624_v38 = vpack.c.bf16 %v132_v33, %v129_v32  ;;  %v1631_v42 = vsub.f32 %v86_v3, %v105_v6  ;;  %s1447_s23 = scalar_lea.vmem %s828_s22, 384  ;;  %p1452_p11 = scmp.lt.s32.totalorder %s828_s22, %s828_s22 }
  0x3f   :  { %77 = vadd.xlane.f32.xlu0 %v838_v19  ;;  %v187_v28 = vand.u32 4294901760, %v1578_v22  ;;  %v1633_v43 = vsub.f32 %v87_v4, %v108_v7  ;;  %v141_v44 = vand.u32 4294901760, %v1627_v40  ;;  %v144_v45 = vand.u32 4294901760, %v1629_v41  ;;  %820 = vst [vmem:[#allocation10 + $0x10] sm:$0xff] %v819_v14  ;;  %p1448_p10 = scmp.ne.s32.totalorder %s828_s22, %s1447_s23  ;;  %p1453_p12 = scmp.lt.s32.totalorder %s1447_s23, %s1447_s23 }
  0x40   :  { %v1642_v47 = vsub.f32 %v1544_v5, %v111_v9  ;;  %v1650_v48 = vpack.c.bf16 %v138_v39, %v135_v37  ;;  %v208_v50 = vand.u32 4294901760, %v1631_v42  ;;  %v1659_v52 = vsub.f32 %v1546_v8, %v114_v12 }
  0x41   :  { %1171 = vmatpush3.bf16.msra.mxu1 %v1567_v18  ;;  %1267 = vmatpush3.bf16.msra.mxu0 %v1567_v18  ;;  %v188_v30 = vsub.f32 %v1578_v22, %v187_v28  ;;  %v215_v51 = vand.u32 4294901760, %v1633_v43  ;;  %v1661_v53 = vsub.f32 %v839_v29, %v839_v29  ;;  %v147_v54 = vand.u32 4294901760, %v1639_v46  ;;  %p1454_p13 = por %p1453_p12, %p1452_p11 }
  0x42   :  { %1173 = vmatprep.subr.bf16.mxu1 %v1590_v23  ;;  %1269 = vmatprep.subr.bf16.mxu0 %v1590_v23  ;;  %v150_v55 = vand.u32 4294901760, %v1652_v49  ;;  %v222_v56 = vand.u32 4294901760, %v1642_v47  ;;  %v1671_v57 = vsub.f32 %v1549_v10, %v117_v16  ;;  %v1676_v58 = vsub.f32 %v1551_v11, %v120_v17 }
  0x43   :  { %79 = vadd.xlane.f32.xlu0 %v839_v29  ;;  %v189_v36 = vand.u32 4294901760, %v188_v30  ;;  %1091 = vmatprep.mubr.f32.mxu0 %v187_v28  ;;  %v1684_v59 = vpack.c.bf16 %v144_v45, %v141_v44  ;;  %v209_v60 = vsub.f32 %v1631_v42, %v208_v50  ;;  %v216_v61 = vsub.f32 %v1633_v43, %v215_v51  ;;  %p1455_p0 = pnand %p1454_p13, %p1448_p10 }
  0x44   :  { %v229_v62 = vand.u32 4294901760, %v1659_v52  ;;  %v197_v63 = vand.u32 4294901760, %v1661_v53  ;;  %v1691_v0 = vsub.f32 %v1572_v20, %v123_v24  ;;  %v1694_v1 = vsub.f32 %v1574_v21, %v126_v25 }
  0x45   :  { %1175 = vmatpush3.bf16.msra.mxu1 %v1590_v23  ;;  %1271 = vmatpush3.bf16.msra.mxu0 %v1590_v23  ;;  %v223_v3 = vsub.f32 %v1642_v47, %v222_v56  ;;  %v236_v4 = vand.u32 4294901760, %v1671_v57  ;;  %v243_v5 = vand.u32 4294901760, %v1676_v58  ;;  %v1707_v6 = vpack.c.bf16 %v150_v55, %v147_v54 }
  0x46   :  { %1177 = vmatprep.subr.bf16.mxu1 %v1607_v31  ;;  %1273 = vmatprep.subr.bf16.mxu0 %v1607_v31  ;;  %v210_v7 = vand.u32 4294901760, %v209_v60  ;;  %v217_v8 = vand.u32 4294901760, %v216_v61  ;;  %v230_v9 = vsub.f32 %v1659_v52, %v229_v62  ;;  %v1292_v10 = vpack.c.bf16 %v215_v51, %v208_v50 }
  0x47   :  { %986 = vmatprep.mubr.f32.mxu1 %v189_v36  ;;  %v198_v11 = vsub.f32 %v1661_v53, %v197_v63  ;;  %v250_v12 = vand.u32 4294901760, %v1691_v0  ;;  %v257_v16 = vand.u32 4294901760, %v1694_v1  ;;  %v224_v17 = vand.u32 4294901760, %v223_v3 }
  0x48   :  { %v237_v19 = vsub.f32 %v1671_v57, %v236_v4  ;;  %v244_v20 = vsub.f32 %v1676_v58, %v243_v5  ;;  %v1720_v21 = vsub.f32 %v1594_v26, %v129_v32  ;;  %v1196_v24 = vpack.c.bf16 %v217_v8, %v210_v7 }
  0x49   :  { %1179 = vmatpush3.bf16.msra.mxu1 %v1607_v31  ;;  %1275 = vmatpush3.bf16.msra.mxu0 %v1607_v31  ;;  %v231_v25 = vand.u32 4294901760, %v230_v9  ;;  %v1727_v28 = vsub.f32 %v1596_v27, %v132_v33  ;;  %v1481_v29 = vmov 0   ;;  %v199_v30 = vand.u32 4294901760, %v198_v11 }
  0x4a   :  { %1181 = vmatprep.subr.bf16.mxu1 %v1624_v38  ;;  %1277 = vmatprep.subr.bf16.mxu0 %v1624_v38  ;;  %v251_v36 = vsub.f32 %v1691_v0, %v250_v12  ;;  %v258_v26 = vsub.f32 %v1694_v1, %v257_v16  ;;  %v1296_v32 = vpack.c.bf16 %v229_v62, %v222_v56  ;;  %v238_v50 = vand.u32 4294901760, %v237_v19 }
  0x4b   :  { %1375 = vset.pattern.permute.xlu1 %v1481_v29  ;;  %1376 = vset.pattern.permute.xlu0 %v1481_v29  ;;  %v264_v51 = vand.u32 4294901760, %v1720_v21  ;;  %v1737_v27 = vsub.f32 %v1611_v34, %v135_v37  ;;  %v1200_v33 = vpack.c.bf16 %v231_v25, %v224_v17  ;;  %v245_v60 = vand.u32 4294901760, %v244_v20 }
  0x4c   :  { %v271_v61 = vand.u32 4294901760, %v1727_v28  ;;  %v1743_v3 = vsub.f32 %v1613_v35, %v138_v39  ;;  %v252_v56 = vand.u32 4294901760, %v251_v36  ;;  %v259_v62 = vand.u32 4294901760, %v258_v26 }
  0x4d   :  { %1183 = vmatpush3.bf16.msra.mxu1 %v1624_v38  ;;  %1279 = vmatpush3.bf16.msra.mxu0 %v1624_v38  ;;  %v1300_v7 = vpack.c.bf16 %v243_v5, %v236_v4  ;;  %v265_v34 = vsub.f32 %v1720_v21, %v264_v51  ;;  %v278_v37 = vand.u32 4294901760, %v1737_v27  ;;  %v1750_v8 = vsub.f32 %v1627_v40, %v141_v44 }
  0x4e   :  { %1185 = vmatprep.subr.bf16.mxu1 %v1650_v48  ;;  %1281 = vmatprep.subr.bf16.mxu0 %v1650_v48  ;;  %v1204_v35 = vpack.c.bf16 %v245_v60, %v238_v50  ;;  %v272_v39 = vsub.f32 %v1727_v28, %v271_v61  ;;  %v1757_v4 = vsub.f32 %v1629_v41, %v144_v45  ;;  %v1482_v5 = vmov 1.0  }
  0x4f   :  { %v1208_v40 = vpack.c.bf16 %v259_v62, %v252_v56  ;;  %v1304_v44 = vpack.c.bf16 %v257_v16, %v250_v12  ;;  %v266_v9 = vand.u32 4294901760, %v265_v34  ;;  %v292_v41 = vand.u32 4294901760, %v1750_v8 }
  0x50   :  { %v1772_v45 = vsub.f32 %v1639_v46, %v147_v54  ;;  %v273_v11 = vand.u32 4294901760, %v272_v39  ;;  %v299_v19 = vand.u32 4294901760, %v1757_v4  ;;  %v1779_v12 = vsub.f32 %v1652_v49, %v150_v55 }
  0x51   :  { %1187 = vmatpush3.bf16.msra.mxu1 %v1650_v48  ;;  %1283 = vmatpush3.bf16.msra.mxu0 %v1650_v48  ;;  %v1308_v16 = vpack.c.bf16 %v271_v61, %v264_v51  ;;  %v1232_v34 = vpack.c.bf16 %v1659_v52, %v1642_v47  ;;  %v1248_v2 = vpack.c.bf16 %v1743_v3, %v1737_v27  ;;  %v76_v47 = vld [vmem:[#allocation3 + $0x8] sm:$0xff] }
  0x52   :  { %1189 = vmatprep.subr.bf16.mxu1 %v1684_v59  ;;  %1285 = vmatprep.subr.bf16.mxu0 %v1684_v59  ;;  %v306_v46 = vand.u32 4294901760, %v1772_v45  ;;  %v1212_v54 = vpack.c.bf16 %v273_v11, %v266_v9  ;;  %v300_v29 = vsub.f32 %v1757_v4, %v299_v19 }
  0x54   :  { %v301_v26 = vand.u32 4294901760, %v300_v29 }
  0x55   :  { %1191 = vmatpush3.bf16.msra.mxu1 %v1684_v59  ;;  %1287 = vmatpush3.bf16.msra.mxu0 %v1684_v59 }
  0x56   :  { %1193 = vmatprep.subr.bf16.mxu1 %v1707_v6  ;;  %1289 = vmatprep.subr.bf16.mxu0 %v1707_v6 }
  0x59   :  { %1195 = vmatpush3.bf16.msra.mxu1 %v1707_v6  ;;  %1291 = vmatpush3.bf16.msra.mxu0 %v1707_v6 }
  0x5a   :  { %1197 = vmatprep.subr.bf16.mxu1 %v1196_v24  ;;  %1293 = vmatprep.subr.bf16.mxu0 %v1292_v10 }
  0x5c   :  { %987 = vmatmul.mubr.f32.vlgmr.msra.gmra.mrb[0].mxu1 %v199_v30  ;;  %1092 = vmatmul.mubr.f32.vlgmr.msra.gmra.mrb[0].mxu0 %v197_v63  ;;  %v285_v63 = vand.u32 4294901760, %v1743_v3  ;;  %v313_v30 = vand.u32 4294901760, %v1779_v12 }
  0x5d   :  { %1199 = vmatpush3.bf16.msra.mxu1 %v1196_v24  ;;  %1295 = vmatpush3.bf16.msra.mxu0 %v1292_v10  ;;  %v279_v10 = vsub.f32 %v1737_v27, %v278_v37  ;;  %v293_v24 = vsub.f32 %v1750_v8, %v292_v41 }
  0x5e   :  { %1201 = vmatprep.subr.bf16.mxu1 %v1200_v33  ;;  %1297 = vmatprep.subr.bf16.mxu0 %v1296_v32  ;;  %v286_v17 = vsub.f32 %v1743_v3, %v285_v63  ;;  %v1312_v49 = vpack.c.bf16 %v285_v63, %v278_v37  ;;  %v314_v50 = vsub.f32 %v1779_v12, %v313_v30 }
  0x5f   :  { %1021 = vmatprep.mubr.msk.f32.mxu1 %vm69_vm1, %v1482_v5  ;;  %1126 = vmatprep.mubr.msk.f32.mxu0 %vm69_vm1, %v1482_v5  ;;  %v280_v20 = vand.u32 4294901760, %v279_v10  ;;  %v294_v55 = vand.u32 4294901760, %v293_v24  ;;  %v1320_v62 = vpack.c.bf16 %v313_v30, %v306_v46 }
  0x60   :  { %v287_v25 = vand.u32 4294901760, %v286_v17  ;;  %v315_v61 = vand.u32 4294901760, %v314_v50 }
  0x61   :  { %1203 = vmatpush3.bf16.msra.mxu1 %v1200_v33  ;;  %1299 = vmatpush3.bf16.msra.mxu0 %v1296_v32  ;;  %v307_v32 = vsub.f32 %v1772_v45, %v306_v46  ;;  %v1220_v51 = vpack.c.bf16 %v301_v26, %v294_v55  ;;  %v1316_v33 = vpack.c.bf16 %v299_v19, %v292_v41 }
  0x62   :  { %1205 = vmatprep.subr.bf16.mxu1 %v1204_v35  ;;  %1301 = vmatprep.subr.bf16.mxu0 %v1300_v7  ;;  %v1216_v36 = vpack.c.bf16 %v287_v25, %v280_v20 }
  0x63   :  { %v308_v60 = vand.u32 4294901760, %v307_v32 }
  0x65   :  { %1207 = vmatpush3.bf16.msra.mxu1 %v1204_v35  ;;  %1303 = vmatpush3.bf16.msra.mxu0 %v1300_v7  ;;  %v1224_v56 = vpack.c.bf16 %v315_v61, %v308_v60  ;;  %v1228_v7 = vpack.c.bf16 %v1633_v43, %v1631_v42  ;;  %v1236_v42 = vpack.c.bf16 %v1676_v58, %v1671_v57 }
  0x66   :  { %1209 = vmatprep.subr.bf16.mxu1 %v1208_v40  ;;  %1305 = vmatprep.subr.bf16.mxu0 %v1304_v44 }
  0x69   :  { %1211 = vmatpush3.bf16.msra.mxu1 %v1208_v40  ;;  %1307 = vmatpush3.bf16.msra.mxu0 %v1304_v44 }
  0x6a   :  { %1213 = vmatprep.subr.bf16.mxu1 %v1212_v54  ;;  %1309 = vmatprep.subr.bf16.mxu0 %v1308_v16 }
  0x6d   :  { %1215 = vmatpush3.bf16.msra.mxu1 %v1212_v54  ;;  %1311 = vmatpush3.bf16.msra.mxu0 %v1308_v16 }
  0x6e   :  { %1217 = vmatprep.subr.bf16.mxu1 %v1216_v36  ;;  %1313 = vmatprep.subr.bf16.mxu0 %v1312_v49 }
  0x71   :  { %1219 = vmatpush3.bf16.msra.mxu1 %v1216_v36  ;;  %1315 = vmatpush3.bf16.msra.mxu0 %v1312_v49 }
  0x72   :  { %1221 = vmatprep.subr.bf16.mxu1 %v1220_v51  ;;  %1317 = vmatprep.subr.bf16.mxu0 %v1316_v33 }
  0x75   :  { %1223 = vmatpush3.bf16.msra.mxu1 %v1220_v51  ;;  %1319 = vmatpush3.bf16.msra.mxu0 %v1316_v33 }
  0x76   :  { %1225 = vmatprep.subr.bf16.mxu1 %v1224_v56  ;;  %1321 = vmatprep.subr.bf16.mxu0 %v1320_v62 }
  0x79   :  { %1227 = vmatpush3.bf16.msra.mxu1 %v1224_v56  ;;  %1323 = vmatpush3.bf16.msra.mxu0 %v1320_v62 }
  0x7a   :  { %1229 = vmatprep.subr.bf16.mxu1 %v1228_v7  ;;  %1325 = vmatprep.subr.bf16.mxu0 %v1559_v15 }
  0x7c   :  { %1022 = vmatmul.mubr.msk.f32.vlgmr.msra.gmra.mrb[0].mxu1 %vm70_vm2, %v1482_v5  ;;  %1127 = vmatmul.mubr.msk.f32.vlgmr.msra.gmra.mrb[0].mxu0 %vm70_vm2, %v1482_v5 }
  0x7d   :  { %1231 = vmatpush3.bf16.msra.mxu1 %v1228_v7  ;;  %1327 = vmatpush3.bf16.msra.mxu0 %v1559_v15  ;;  %v1240_v15 = vpack.c.bf16 %v1694_v1, %v1691_v0 }
  0x7e   :  { %1233 = vmatprep.subr.bf16.mxu1 %v1232_v34  ;;  %1329 = vmatprep.subr.bf16.mxu0 %v1567_v18 }
  0x7f   :  { %1056 = vmatprep.mubr.f32.mxu1 %v1578_v22  ;;  %1161 = vmatprep.mubr.msk.f32.mxu0 %vm69_vm1, %v1482_v5  ;;  %v1244_v22 = vpack.c.bf16 %v1727_v28, %v1720_v21 }
  0x81   :  { %1235 = vmatpush3.bf16.msra.mxu1 %v1232_v34  ;;  %1331 = vmatpush3.bf16.msra.mxu0 %v1567_v18  ;;  %v1252_v18 = vpack.c.bf16 %v1757_v4, %v1750_v8 }
  0x82   :  { %1237 = vmatprep.subr.bf16.mxu1 %v1236_v42  ;;  %1333 = vmatprep.subr.bf16.mxu0 %v1590_v23 }
  0x85   :  { %1239 = vmatpush3.bf16.msra.mxu1 %v1236_v42  ;;  %1335 = vmatpush3.bf16.msra.mxu0 %v1590_v23  ;;  %v1256_v23 = vpack.c.bf16 %v1779_v12, %v1772_v45 }
  0x86   :  { %1241 = vmatprep.subr.bf16.mxu1 %v1240_v15  ;;  %1337 = vmatprep.subr.bf16.mxu0 %v1607_v31 }
  0x89   :  { %1243 = vmatpush3.bf16.msra.mxu1 %v1240_v15  ;;  %1339 = vmatpush3.bf16.msra.mxu0 %v1607_v31  ;;  %v75_v31 = vld [vmem:[#allocation3] sm:$0xff] }
  0x8a   :  { %1245 = vmatprep.subr.bf16.mxu1 %v1244_v22  ;;  %1341 = vmatprep.subr.bf16.mxu0 %v1624_v38 }
  0x8d   :  { %1247 = vmatpush3.bf16.msra.mxu1 %v1244_v22  ;;  %1343 = vmatpush3.bf16.msra.mxu0 %v1624_v38 }
  0x8e   :  { %1249 = vmatprep.subr.bf16.mxu1 %v1248_v2  ;;  %1345 = vmatprep.subr.bf16.mxu0 %v1650_v48 }
  0x91   :  { %1251 = vmatpush3.bf16.msra.mxu1 %v1248_v2  ;;  %1347 = vmatpush3.bf16.msra.mxu0 %v1650_v48 }
  0x92   :  { %1253 = vmatprep.subr.bf16.mxu1 %v1252_v18  ;;  %1349 = vmatprep.subr.bf16.mxu0 %v1684_v59 }
  0x95   :  { %1255 = vmatpush3.bf16.msra.mxu1 %v1252_v18  ;;  %1351 = vmatpush3.bf16.msra.mxu0 %v1684_v59 }
  0x96   :  { %1257 = vmatprep.subr.bf16.mxu1 %v1256_v23  ;;  %1353 = vmatprep.subr.bf16.mxu0 %v1707_v6 }
  0x99   :  { %1259 = vmatpush3.bf16.msra.mxu1 %v1256_v23  ;;  %1355 = vmatpush3.bf16.msra.mxu0 %v1707_v6 }
  0x9c   :  { %1057 = vmatmul.mubr.f32.vlgmr.msra.gmra.mrb[0].mxu1 %v1661_v53  ;;  %1162 = vmatmul.mubr.msk.f32.vlgmr.msra.gmra.mrb[0].mxu0 %vm70_vm2, %v1482_v5 }
  0xcc   :  { %v78_v38 = vpop.xlane.xlu0 %77 }
  0xcd   :  { %v81_v43 = vadd.f32 %v78_v38, %v75_v31 }
  0xcf   :  { %84 = vst.msk [vmem:[#allocation3] sm:$0xff] %vm58_vm0, %v81_v43 }
  0xd0   :  { %v80_v48 = vpop.xlane.xlu0 %79 }
  0xd1   :  { %v82_v52 = vadd.f32 %v80_v48, %v76_v47 }
  0xd3   :  { %85 = vst.msk [vmem:[#allocation3 + $0x8] sm:$0xff] %vm58_vm0, %v82_v52 }
  0xd6   :  { %v795_v57 = vld [vmem:[#allocation3] sm:$0xff] }
  0xd7   :  { %v797_v58 = vmax.f32 %v795_v57, 1.0 }
  0xd9   :  { %1377 = vrcp.f32 %v797_v58 }
  0xda   :  { %v796_v59 = vld [vmem:[#allocation3 + $0x8] sm:$0xff] }
  0xdb   :  { %v798_v53 = vmax.f32 %v796_v59, 1.0 }
  0xdd   :  { %1379 = vrcp.f32 %v798_v53 }
  0xe3   :  { %v1378_v0 = vpop.eup %1377 }
  0xe4   :  { %807 = vperm.xlu1 %1375, %v1378_v0  }
  0xe7   :  { %v1380_v13 = vpop.eup %1379 }
  0xe8   :  { %812 = vperm.xlu1 %1375, %v1380_v13  }
 0x163   :  { %v808_v1 = vpop.permute.xlu1 %807 }
 0x167   :  { %v813_v37 = vpop.permute.xlu1 %812 }
 0x16f   :  { %v1058_v6 = vpop.f32.mrb[0].mxu1  ;;  %v1163_v21 = vpop.f32.mrb[0].mxu0 }
 0x170   :  { %v1356_v28 = vadd.f32 %v1163_v21, %v1058_v6  ;;  %v462_v27 = vpop.f32.mrb[1].mxu1  ;;  %v778_v3 = vpop.f32.mrb[1].mxu0 }
 0x171   :  { %v1357_v8 = vadd.f32 %v778_v3, %v462_v27 }
 0x172   :  { %v816_v35 = vmul.f32 %v1356_v28, %v813_v37 }
 0x173   :  { %v815_v39 = vmul.f32 %v1357_v8, %v808_v1 }
 0x174   :  { %818 = vst [vmem:[#allocation10 + $0x8] sm:$0xff] %v816_v35 }
 0x175   :  { %817 = vst [vmem:[#allocation10] sm:$0xff] %v815_v39 }
 0x176   :  { %1458 = shalt.err (!%p1455_p0)
}
 0x177   :  { %s1459_s26 = scalar_lea.hbm %s1854_s3, 384 }
 0x178   :  { %p1460_p1 = scmp.ne.s32.totalorder %s1854_s3, %s1459_s26  ;;  %p1463_p2 = scmp.lt.u32.totalorder %s1459_s26, %s1854_s3 }
 0x17a   :  { %p1465_p3 = pnand %p1463_p2, %p1460_p1 }
 0x17c   :  { %1468 = shalt.err (!%p1465_p3)
}
 0x17d   :  { %830 = dma.vmem_to_hbm [thread:$0]  %s828_s22, 384, %s1854_s3, [#allocation6]  }
 0x17e   :  { %1473 = dma.done.wait [#allocation6], 384  }
 0x17f   :  { %1474 = vsyncadd [#allocation6], 4294966912 }
 0x180   :  { %834 = vsyncpa [#allocation5], 1 }
 0x181   :  { %835 = vsyncpa [#allocation8], 1 }
 0x182   :  { %836 = vsyncpa [#allocation6], 1 }

</bundles_post_ra>
